<compile_context>
chip_gen: v6e
topology: v6e:2x2x1
jax: 0.10.0
libtpu: 0.0.40
codegen_flags: <defaults>
</compile_context>

<pallas_src>
import jax
import jax.numpy as jnp
from jax import lax
from jax.experimental import pallas as pl
from jax.experimental.pallas import tpu as pltpu


def _critic_kernel(x_ref, w1_ref, b1_ref, w2_ref, b2_ref, w3_ref, b3_ref, o_ref):
    # x is streamed from HBM as f32; cast to bf16 in-kernel (free VPU filler).
    x = x_ref[...].astype(jnp.bfloat16)                       # (tb, in_dim)
    # Layer 1: Linear(in_dim, width) + ReLU  (MXU bf16 in, f32 accumulate)
    h1 = jnp.dot(x, w1_ref[...], preferred_element_type=jnp.float32) + b1_ref[...]
    h1 = jnp.maximum(h1, 0.0)
    # Layer 2: Linear(width, width) + ReLU
    h2 = jnp.dot(h1.astype(jnp.bfloat16), w2_ref[...],
                 preferred_element_type=jnp.float32) + b2_ref[...]
    h2 = jnp.maximum(h2, 0.0)
    # Layer 3: Linear(width, 1) computed as (1,width) . (tb,width)^T -> (1, tb)
    # so the per-tile result is a lane-dense row (unmasked HBM writeback)
    # instead of a (tb, 1) column.  w3 kept in f32 for accuracy, b3 is SMEM.
    v = lax.dot_general(w3_ref[...], h2, (((1,), (1,)), ((), ())),
                        preferred_element_type=jnp.float32)   # (1, tb)
    o_ref[...] = (v + b3_ref[0, 0]).astype(o_ref.dtype)


def _cdiv(a, b):
    return -(-a // b)


def _round_up(x, m):
    return ((x + m - 1) // m) * m


def _pick_tiles(B, block_b):
    """Balanced batch tiling: tb ~= B / n_tiles, rounded up to a sublane (8)."""
    n = _cdiv(B, block_b)
    # Prefer >=2 tiles when the batch is big enough: v7x has 2 TensorCores and
    # the batch axis is marked "parallel", so a single-step grid idles one TC.
    if n == 1 and B >= 16:
        n = 2
    tb = _round_up(_cdiv(B, n), 8)
    n = _cdiv(B, tb)
    return tb, n


def critic_forward(state, params, *, block_b=512):
    """state: (B, in_dim) f32.  params: dict of w1,b1,w2,b2,w3,b3 (f32)."""
    B, in_dim = state.shape
    width = params["w1"].shape[1]

    tb, n_tiles = _pick_tiles(B, block_b)

    # Weights resident in VMEM: matmul weights in bf16 (MXU), biases / final
    # row in f32 (epilogue on the VPU stays f32-exact).
    w1 = params["w1"].astype(jnp.bfloat16)
    w2 = params["w2"].astype(jnp.bfloat16)
    b1 = params["b1"].reshape(1, width).astype(jnp.float32)
    b2 = params["b2"].reshape(1, width).astype(jnp.float32)
    w3_row = params["w3"].reshape(1, width).astype(jnp.float32)  # lane-dense
    b3 = params["b3"].reshape(1, 1).astype(jnp.float32)          # SMEM scalar

    grid = (n_tiles,)

    flops = 2 * B * (in_dim * width + width * width + width)
    bytes_accessed = (B * in_dim * 4                       # x stream (f32)
                      + (in_dim * width + width * width) * 2  # bf16 weights
                      + (3 * width + 1) * 4                # b1, b2, w3, b3
                      + n_tiles * tb * 4)                  # output slab
    cost = pl.CostEstimate(flops=flops, transcendentals=0,
                           bytes_accessed=bytes_accessed)

    # VMEM budget: 3-deep x pipeline + (worst case double-buffered) weights +
    # f32 intermediates + output buffers, with generous headroom, capped at the
    # smallest physical VMEM (v7x, 64 MiB).
    est = (3 * tb * in_dim * 4
           + 2 * (in_dim * width + width * width) * 2
           + 3 * width * 4
           + 3 * tb * width * 4
           + 2 * tb * 4)
    vmem_limit = int(min(max(2 * est, 32 * 2 ** 20), 64 * 2 ** 20))

    def build(use_pipeline_mode):
        def resident(shape):
            if use_pipeline_mode:
                # Constant index_map -> single-buffer; halves resident VMEM.
                return pl.BlockSpec(shape, lambda i: (0, 0),
                                    pipeline_mode=pl.Buffered(1))
            return pl.BlockSpec(shape, lambda i: (0, 0))

        if use_pipeline_mode:
            # Tiny per-tile compute (K=32, N=64): buffer the cheap x tiles
            # 3-deep so the HBM DMA latency stays hidden.
            x_spec = pl.BlockSpec((tb, in_dim), lambda i: (i, 0),
                                  pipeline_mode=pl.Buffered(3))
        else:
            x_spec = pl.BlockSpec((tb, in_dim), lambda i: (i, 0))

        return pl.pallas_call(
            _critic_kernel,
            out_shape=jax.ShapeDtypeStruct((n_tiles, tb), jnp.float32),
            grid=grid,
            in_specs=[
                x_spec,                                         # x: streamed f32 tiles
                resident((in_dim, width)),                      # w1 (bf16), resident
                resident((1, width)),                           # b1 (f32), resident
                resident((width, width)),                       # w2 (bf16), resident
                resident((1, width)),                           # b2 (f32), resident
                resident((1, width)),                           # w3 row (f32), resident
                pl.BlockSpec(memory_space=pltpu.MemorySpace.SMEM),  # b3 scalar
            ],
            # Lane-dense output: one (1, tb) row per grid step.
            out_specs=pl.BlockSpec((1, tb), lambda i: (i, 0)),
            compiler_params=pltpu.CompilerParams(
                dimension_semantics=("parallel",),
                vmem_limit_bytes=vmem_limit),
            cost_estimate=cost,
        )

    try:
        out = build(True)(state, w1, b1, w2, b2, w3_row, b3)
    except Exception:
        # Fallback for jax versions without BlockSpec pipeline_mode support.
        out = build(False)(state, w1, b1, w2, b2, w3_row, b3)

    # (n_tiles, tb) slab -> (B, 1); rows past B are masked/garbage and dropped.
    return out.reshape(-1)[:B][:, None]


def _orthogonal(key, shape, gain):
    """Deterministic orthogonal init (matches torch.nn.init.orthogonal_ semantics)."""
    rows, cols = shape
    n = max(rows, cols)
    a = jax.random.normal(key, (n, n), dtype=jnp.float32)
    q, r = jnp.linalg.qr(a)
    q = q * jnp.sign(jnp.diag(r))
    return gain * q[:rows, :cols]


def init_critic_params(key, in_dim, width):
    gain = jnp.sqrt(2.0)  # calculate_gain('relu')
    k1, k2, k3, k4 = jax.random.split(key, 4)
    # init_layer: orthogonal weights (gain=sqrt(2)), zero bias   (layers 1 & 2)
    w1 = _orthogonal(k1, (in_dim, width), gain)          # stored as (in, out)
    b1 = jnp.zeros((1, width), jnp.float32)
    w2 = _orthogonal(k2, (width, width), gain)
    b2 = jnp.zeros((1, width), jnp.float32)
    # last layer: default PyTorch Linear init  U(-1/sqrt(fan_in), 1/sqrt(fan_in))
    bound = 1.0 / jnp.sqrt(jnp.float32(width))
    w3 = jax.random.uniform(k3, (width, 1), jnp.float32, -bound, bound)
    b3 = jax.random.uniform(k4, (1, 1), jnp.float32, -bound, bound)
    return {"w1": w1, "b1": b1, "w2": w2, "b2": b2, "w3": w3, "b3": b3}


def critic_reference(state, p):
    """Pure-f32 reference of the same forward pass."""
    h1 = jnp.maximum(state @ p["w1"] + p["b1"], 0.0)
    h2 = jnp.maximum(h1 @ p["w2"] + p["b2"], 0.0)
    return h2 @ p["w3"] + p["b3"]


def critic_reference_mixed(state, p):
    """Reference with the same precision choices as the kernel (bf16 MXU, f32 acc)."""
    xb = state.astype(jnp.bfloat16)
    w1 = p["w1"].astype(jnp.bfloat16)
    w2 = p["w2"].astype(jnp.bfloat16)
    h1 = jnp.maximum(
        jnp.dot(xb, w1, preferred_element_type=jnp.float32) + p["b1"], 0.0)
    h2 = jnp.maximum(
        jnp.dot(h1.astype(jnp.bfloat16), w2,
                preferred_element_type=jnp.float32) + p["b2"], 0.0)
    return h2 @ p["w3"].astype(jnp.float32) + p["b3"]


if __name__ == "__main__":
    B, in_dim, width = 8, 32, 64
    key = jax.random.PRNGKey(0)
    k_state, k_params = jax.random.split(key)

    state = jax.random.normal(k_state, (B, in_dim), dtype=jnp.float32)
    params = init_critic_params(k_params, in_dim, width)

    v_out = critic_forward(state, params)
    jax.block_until_ready(v_out)
    assert v_out.shape == (B, 1)

    # Tight check against a reference using the same bf16/f32 precision choices.
    v_mixed = critic_reference_mixed(state, params)
    assert jnp.allclose(v_out, v_mixed, atol=1e-3, rtol=1e-3), float(
        jnp.max(jnp.abs(v_out - v_mixed)))

    # Loose sanity check against the full-f32 reference (bf16 weight rounding).
    v_f32 = critic_reference(state, params)
    assert jnp.allclose(v_out, v_f32, atol=0.25, rtol=0.25)

    print("KERNEL_OK")
</pallas_src>

<mosaic_0001>
module attributes {stable_mosaic.version = 11 : i64} {
  func.func @_critic_kernel(%arg0: i32, %arg1: memref<8x32xf32, #tpu.memory_space<vmem>>, %arg2: memref<32x64xbf16, #tpu.memory_space<vmem>>, %arg3: memref<1x64xf32, #tpu.memory_space<vmem>>, %arg4: memref<64x64xbf16, #tpu.memory_space<vmem>>, %arg5: memref<1x64xf32, #tpu.memory_space<vmem>>, %arg6: memref<1x64xf32, #tpu.memory_space<vmem>>, %arg7: memref<1x1xf32, #tpu.memory_space<smem>>, %arg8: memref<1x8xf32, #tpu.memory_space<vmem>>) attributes {dimension_semantics = [#tpu.dimension_semantics<parallel>], iteration_bounds = array<i64: 1>, scalar_prefetch = 0 : i64, scratch_operands = 0 : i64, tpu.core_type = #tpu.core_type<tc>, window_params = [{transform_indices = @transform_0, window_bounds = array<i64: 8, 32>}, {pipeline_mode = #tpu.pipeline_mode<synchronous>, transform_indices = @transform_1, window_bounds = array<i64: 32, 64>}, {pipeline_mode = #tpu.pipeline_mode<synchronous>, transform_indices = @transform_2, window_bounds = array<i64: 1, 64>}, {pipeline_mode = #tpu.pipeline_mode<synchronous>, transform_indices = @transform_3, window_bounds = array<i64: 64, 64>}, {pipeline_mode = #tpu.pipeline_mode<synchronous>, transform_indices = @transform_4, window_bounds = array<i64: 1, 64>}, {pipeline_mode = #tpu.pipeline_mode<synchronous>, transform_indices = @transform_5, window_bounds = array<i64: 1, 64>}, {transform_indices = @transform_6, window_bounds = array<i64: 1, 1>}, {transform_indices = @transform_7, window_bounds = array<i64: 1, 8>}]} {
    %c0 = arith.constant 0 : index
    %c0_0 = arith.constant 0 : index
    %0 = vector.load %arg1[%c0, %c0_0] : memref<8x32xf32, #tpu.memory_space<vmem>>, vector<8x32xf32>
    %1 = arith.truncf %0 : vector<8x32xf32> to vector<8x32xbf16>
    %c0_1 = arith.constant 0 : index
    %c0_2 = arith.constant 0 : index
    %2 = vector.load %arg2[%c0_1, %c0_2] : memref<32x64xbf16, #tpu.memory_space<vmem>>, vector<32x64xbf16>
    %cst = arith.constant dense<0.000000e+00> : vector<8x64xf32>
    %3 = tpu.matmul %1, %2, %cst {dimension_numbers = #tpu.dot_dimension_numbers<[1], [0], [0], [1], [0, 0, 1, 1], [], []>} : vector<8x32xbf16>, vector<32x64xbf16>, vector<8x64xf32> -> vector<8x64xf32>
    %c0_3 = arith.constant 0 : index
    %c0_4 = arith.constant 0 : index
    %4 = vector.load %arg3[%c0_3, %c0_4] : memref<1x64xf32, #tpu.memory_space<vmem>>, vector<1x64xf32>
    %5 = vector.broadcast %4 : vector<1x64xf32> to vector<8x64xf32>
    %6 = arith.addf %3, %5 : vector<8x64xf32>
    %cst_5 = arith.constant 0.000000e+00 : f32
    %7 = vector.broadcast %cst_5 : f32 to vector<8x64xf32>
    %8 = arith.maximumf %6, %7 : vector<8x64xf32>
    %9 = arith.truncf %8 : vector<8x64xf32> to vector<8x64xbf16>
    %c0_6 = arith.constant 0 : index
    %c0_7 = arith.constant 0 : index
    %10 = vector.load %arg4[%c0_6, %c0_7] : memref<64x64xbf16, #tpu.memory_space<vmem>>, vector<64x64xbf16>
    %cst_8 = arith.constant dense<0.000000e+00> : vector<8x64xf32>
    %11 = tpu.matmul %9, %10, %cst_8 {dimension_numbers = #tpu.dot_dimension_numbers<[1], [0], [0], [1], [0, 0, 1, 1], [], []>} : vector<8x64xbf16>, vector<64x64xbf16>, vector<8x64xf32> -> vector<8x64xf32>
    %c0_9 = arith.constant 0 : index
    %c0_10 = arith.constant 0 : index
    %12 = vector.load %arg5[%c0_9, %c0_10] : memref<1x64xf32, #tpu.memory_space<vmem>>, vector<1x64xf32>
    %13 = vector.broadcast %12 : vector<1x64xf32> to vector<8x64xf32>
    %14 = arith.addf %11, %13 : vector<8x64xf32>
    %cst_11 = arith.constant 0.000000e+00 : f32
    %15 = vector.broadcast %cst_11 : f32 to vector<8x64xf32>
    %16 = arith.maximumf %14, %15 : vector<8x64xf32>
    %c0_12 = arith.constant 0 : index
    %c0_13 = arith.constant 0 : index
    %17 = vector.load %arg6[%c0_12, %c0_13] : memref<1x64xf32, #tpu.memory_space<vmem>>, vector<1x64xf32>
    %cst_14 = arith.constant dense<0.000000e+00> : vector<1x8xf32>
    %18 = tpu.matmul %17, %16, %cst_14 {dimension_numbers = #tpu.dot_dimension_numbers<[1], [1], [0], [0], [0, 0, 1, 0], [], []>} : vector<1x64xf32>, vector<8x64xf32>, vector<1x8xf32> -> vector<1x8xf32>
    %c0_15 = arith.constant 0 : index
    %c0_16 = arith.constant 0 : index
    %19 = memref.load %arg7[%c0_15, %c0_16] : memref<1x1xf32, #tpu.memory_space<smem>>
    %20 = vector.broadcast %19 : f32 to vector<1x8xf32>
    %21 = arith.addf %18, %20 : vector<1x8xf32>
    %c0_17 = arith.constant 0 : index
    %c0_18 = arith.constant 0 : index
    %22 = vector.load %arg8[%c0_17, %c0_18] : memref<1x8xf32, #tpu.memory_space<vmem>>, vector<1x8xf32>
    tpu.vector_store %arg8[%c0_17, %c0_18], %21 {strides = array<i32>} : memref<1x8xf32, #tpu.memory_space<vmem>>, vector<1x8xf32>,
    return
  }
  func.func @transform_0(%arg0: i32) -> (i32, i32) {
    %c0_i32 = arith.constant 0 : i32
    %c0_i32_0 = arith.constant 0 : i32
    return %arg0, %c0_i32 : i32, i32
  }
  func.func @transform_1(%arg0: i32) -> (i32, i32) {
    %c0_i32 = arith.constant 0 : i32
    %c0_i32_0 = arith.constant 0 : i32
    %c0_i32_1 = arith.constant 0 : i32
    return %c0_i32, %c0_i32_0 : i32, i32
  }
  func.func @transform_2(%arg0: i32) -> (i32, i32) {
    %c0_i32 = arith.constant 0 : i32
    %c0_i32_0 = arith.constant 0 : i32
    %c0_i32_1 = arith.constant 0 : i32
    return %c0_i32, %c0_i32_0 : i32, i32
  }
  func.func @transform_3(%arg0: i32) -> (i32, i32) {
    %c0_i32 = arith.constant 0 : i32
    %c0_i32_0 = arith.constant 0 : i32
    %c0_i32_1 = arith.constant 0 : i32
    return %c0_i32, %c0_i32_0 : i32, i32
  }
  func.func @transform_4(%arg0: i32) -> (i32, i32) {
    %c0_i32 = arith.constant 0 : i32
    %c0_i32_0 = arith.constant 0 : i32
    %c0_i32_1 = arith.constant 0 : i32
    return %c0_i32, %c0_i32_0 : i32, i32
  }
  func.func @transform_5(%arg0: i32) -> (i32, i32) {
    %c0_i32 = arith.constant 0 : i32
    %c0_i32_0 = arith.constant 0 : i32
    %c0_i32_1 = arith.constant 0 : i32
    return %c0_i32, %c0_i32_0 : i32, i32
  }
  func.func @transform_6(%arg0: i32) -> (i32, i32) {
    %c0_i32 = arith.constant 0 : i32
    %c0_i32_0 = arith.constant 0 : i32
    %c0_i32_1 = arith.constant 0 : i32
    return %c0_i32, %c0_i32_0 : i32, i32
  }
  func.func @transform_7(%arg0: i32) -> (i32, i32) {
    %c0_i32 = arith.constant 0 : i32
    %c0_i32_0 = arith.constant 0 : i32
    return %arg0, %c0_i32 : i32, i32
  }
}

</mosaic_0001>

<bundles_post_ra>
// kernel: tpu_custom_call.1
= control target key start
LH: loop header
LB: loop body
LE: loop exit
PB: predicated region body
PF: predicated region fallthrough
CT: control target
= control target key end

     0   :  { %13 = vsyncpa [#allocation4], 0  ;;  %s542_s0 = inlined_call_operand.hbm [shape: f32[8,32], index: 0, kind: input, shape index: {}]   ;;  %s543_s1 = inlined_call_operand.hbm [shape: bf16[32,64], index: 1, kind: input, shape index: {}]   ;;  %s544_s2 = inlined_call_operand.vmem [shape: f32[1,64], index: 2, kind: input, shape index: {}]   ;;  %s545_s3 = inlined_call_operand.hbm [shape: bf16[64,64], index: 3, kind: input, shape index: {}]   ;;  %s546_s4 = inlined_call_operand.vmem [shape: f32[1,64], index: 4, kind: input, shape index: {}]   ;;  %s547_s5 = inlined_call_operand.vmem [shape: f32[1,64], index: 5, kind: input, shape index: {}]   ;;  %s548_s6 = inlined_call_operand.<no memory space> [shape: f32[1,1], index: 6, kind: input, shape index: {}]   ;;  %s549_s7 = inlined_call_operand.hbm [shape: f32[1,8], index: 7, kind: output, shape index: {}]  }
   0x1   :  { %14 = vsyncpa [#allocation7], 0 }
   0x2   :  { %15 = vsyncpa [#allocation5], 0  ;;  %s467_s24 = smov [#allocation6]  }
   0x3   :  { %s31_s25 = sshll.u32 %s467_s24, 4  ;;  %s32_s25 = int_to_ptr.vmem [resolvable:$true] %s31_s25 }
   0x4   :  { %s389_s26 = scalar_lea.vmem %s32_s25, 256  ;;  %p394_p1 = scmp.lt.s32.totalorder %s32_s25, %s32_s25 }
   0x5   :  { %p390_p0 = scmp.ne.s32.totalorder %s32_s25, %s389_s26  ;;  %p395_p2 = scmp.lt.s32.totalorder %s389_s26, %s389_s26 }
   0x7   :  { %p396_p3 = por %p395_p2, %p394_p1 }
   0x9   :  { %p397_p4 = pnand %p396_p3, %p390_p0 }
   0xb   :  { %400 = shalt.err (!%p397_p4)
}
   0xc   :  { %s468_s27 = smov 64   ;;  %s469_s28 = smov 4  }
   0xd   :  { %37 = dma.hbm_to_vmem [thread:$0]  %s543_s1, 256, %s32_s25, [#allocation7], %s468_s27, %s468_s27, %s469_s28  }
   0xe   :  { %s470_s8 = smov [#allocation3]   ;;  %s471_s10 = smov [#allocation8]  }
   0xf   :  { %s22_s9 = sshll.u32 %s470_s8, 4  ;;  %s45_s11 = sshll.u32 %s471_s10, 4  ;;  %s23_s9 = int_to_ptr.vmem [resolvable:$true] %s22_s9  ;;  %s46_s11 = int_to_ptr.vmem [resolvable:$true] %s45_s11 }
  0x10   :  { %s409_s12 = scalar_lea.vmem %s23_s9, 128  ;;  %p414_p6 = scmp.lt.s32.totalorder %s23_s9, %s23_s9 }
  0x11   :  { %p410_p5 = scmp.ne.s32.totalorder %s23_s9, %s409_s12  ;;  %p415_p7 = scmp.lt.s32.totalorder %s409_s12, %s409_s12 }
  0x13   :  { %p416_p8 = por %p415_p7, %p414_p6 }
  0x15   :  { %p417_p9 = pnand %p416_p8, %p410_p5 }
  0x17   :  { %420 = shalt.err (!%p417_p9)
}
  0x18   :  { %25 = dma.hbm_to_vmem [thread:$0]  %s542_s0, 128, %s23_s9, [#allocation4]  }
  0x19   :  { %s429_s15 = scalar_lea.vmem %s46_s11, 512  ;;  %p434_p11 = scmp.lt.s32.totalorder %s46_s11, %s46_s11 }
  0x1a   :  { %p430_p10 = scmp.ne.s32.totalorder %s46_s11, %s429_s15  ;;  %p435_p12 = scmp.lt.s32.totalorder %s429_s15, %s429_s15 }
  0x1c   :  { %p436_p13 = por %p435_p12, %p434_p11 }
  0x1e   :  { %p437_p0 = pnand %p436_p13, %p430_p10 }
  0x20   :  { %440 = shalt.err (!%p437_p0)
}
  0x21   :  { %51 = dma.hbm_to_vmem [thread:$0]  %s545_s3, 512, %s46_s11, [#allocation7], %s468_s27, %s468_s27, %s469_s28  }
  0x22   :  { %461 = dma.done.wait [#allocation4], 128  }
  0x23   :  { %462 = vsyncadd [#allocation4], 4294967168 }
  0x24   :  { %463 = dma.done.wait [#allocation7], 768  }
  0x25   :  { %464 = vsyncadd [#allocation7], 4294966528  ;;  %v472_v0 = vmov 0.0   ;;  %vm473_vm0 = vmmov 0   ;;  %v375_v1 = vld [vmem:[#allocation6 + $0x8] sm:$0xff]   ;;  %v376_v2 = vld [vmem:[#allocation6] sm:$0xff]   ;;  %v225_v25 = vstv %s548_s6 }
  0x26   :  { %342 = vmatprep.subr.bf16.mxu0 %v472_v0  ;;  %346 = vmatprep.mubr.msk.bf16.mxu0 %vm473_vm0, %v472_v0  ;;  %v68_v3 = vld [vmem:[#allocation3] sm:$0xff]  ;;  %v377_v4 = vld [vmem:[#allocation8 + $0x18] sm:$0xff]   ;;  %v378_v5 = vld [vmem:[#allocation8 + $0x10] sm:$0xff]   ;;  %vm93_vm1 = vcmask 261120   ;;  %vm178_vm2 = vcmask 523264   ;;  %s474_s22 = smov [#allocation9]  }
  0x27   :  { %350 = vmatprep.subr.bf16.mxu1 %v472_v0  ;;  %358 = vmatprep.mubr.msk.bf16.mxu1 %vm473_vm0, %v472_v0  ;;  %v69_v6 = vpack.c.bf16 %v68_v3, %v68_v3  ;;  %v379_v7 = vld [vmem:[#allocation8 + $0x8] sm:$0xff]   ;;  %v380_v8 = vld [vmem:[#allocation8] sm:$0xff]   ;;  %s310_s23 = sshll.u32 %s474_s22, 4  ;;  %vm302_vm3 = vcmask 57344   ;;  %s311_s23 = int_to_ptr.vmem [resolvable:$true] %s310_s23 }
  0x28   :  { %343 = vmatpush3.bf16.msra.mxu0 %v375_v1  ;;  %351 = vmatpush3.bf16.msra.mxu1 %v377_v4  ;;  %v320_v9 = vld [vmem:[%s544_s2] ss:$0 sm:$0xff]  ;;  %s445_s24 = scalar_lea.vmem %s311_s23, 32  ;;  %p446_p2 = scmp.lt.s32.totalorder %s311_s23, %s311_s23 }
  0x29   :  { %344 = vmatprep.subr.bf16.mxu0 %v472_v0  ;;  %352 = vmatprep.subr.bf16.mxu1 %v472_v0  ;;  %v324_v17 = vld [vmem:[%s546_s4] ss:$0 sm:$0xff]  ;;  %s441_s4 = scalar_lea.vmem %s311_s23, 16 }
  0x2a   :  { %v223_v23 = vld [vmem:[%s547_s5] sm:$0x1]  ;;  %p442_p1 = scmp.ne.s32.totalorder %s311_s23, %s441_s4  ;;  %p447_p3 = scmp.lt.s32.totalorder %s445_s24, %s441_s4 }
  0x2c   :  { %345 = vmatpush3.bf16.msra.mxu0 %v376_v2  ;;  %353 = vmatpush3.bf16.msra.mxu1 %v378_v5  ;;  %p448_p4 = por %p447_p3, %p446_p2 }
  0x2d   :  { %362 = vmatprep.subr.mxu0 %v472_v0  ;;  %354 = vmatprep.subr.bf16.mxu1 %v472_v0 }
  0x2e   :  { %p449_p5 = pnand %p448_p4, %p442_p1 }
  0x2f   :  { %347 = vmatmul.mubr.msk.bf16.vlgmr.msra.gmra.mxu0 %vm93_vm1, %v69_v6 }
  0x30   :  { %364 = vmatprep.mubr.msk.f32.mxu0 %vm473_vm0, %v472_v0  ;;  %355 = vmatpush3.bf16.msra.mxu1 %v379_v7 }
  0x31   :  { %356 = vmatprep.subr.bf16.mxu1 %v472_v0 }
  0x34   :  { %357 = vmatpush3.bf16.msra.mxu1 %v380_v8 }
  0xef   :  { %v131_v10 = vpop.f32.mrf.mxu0 }
  0xf0   :  { %v132_v11 = vadd.f32 %v320_v9, %v131_v10 }
  0xf1   :  { %v348_v12 = vpop.f32.mrf.mxu0 }
  0xf2   :  { %v137_v13 = vmax.f32 %v132_v11, 0.0 }
  0xf3   :  { %v134_v14 = vpop.f32.mrf.mxu0 }
  0xf4   :  { %v138_v15 = vpack.c.bf16 %v137_v13, %v137_v13 }
  0xf5   :  { %v349_v16 = vpop.f32.mrf.mxu0 }
  0xf6   :  { %359 = vmatmul.mubr.msk.bf16.vlgmr.msra.gmra.mxu1 %vm178_vm2, %v138_v15 }
 0x1b6   :  { %v216_v18 = vpop.f32.mrf.mxu1 }
 0x1b7   :  { %v217_v19 = vadd.f32 %v324_v17, %v216_v18 }
 0x1b8   :  { %v360_v20 = vpop.f32.mrf.mxu1 }
 0x1b9   :  { %v222_v21 = vmax.f32 %v217_v19, 0.0 }
 0x1ba   :  { %v219_v22 = vpop.f32.mrf.mxu1 }
 0x1bb   :  { %363 = vmatpush3.xpose.msk.msra.mxu0 %vm178_vm2, %v222_v21 }
 0x1bc   :  { %v361_v24 = vpop.f32.mrf.mxu1 }
 0x1be   :  { %365 = vmatmul.mubr.msk.f32.vlgmr.msra.gmra.mxu0 %vm178_vm2, %v223_v23 }
 0x27e   :  { %v298_v26 = vpop.f32.mrf.mxu0 }
 0x27f   :  { %v299_v27 = vadd.f32 %v298_v26, %v225_v25 }
 0x280   :  { %v366_v28 = vpop.f32.mrf.mxu0 }
 0x281   :  { %303 = vst.msk [vmem:[#allocation9] sm:$0x1] %vm302_vm3, %v299_v27 }
 0x282   :  { %452 = shalt.err (!%p449_p5)
}
 0x283   :  { %313 = dma.vmem_to_hbm [thread:$0]  %s311_s23, 16, %s549_s7, [#allocation5]  }
 0x284   :  { %465 = dma.done.wait [#allocation5], 16  }
 0x285   :  { %466 = vsyncadd [#allocation5], 4294967280 }
 0x286   :  { %317 = vsyncpa [#allocation4], 1 }
 0x287   :  { %318 = vsyncpa [#allocation7], 1 }
 0x288   :  { %319 = vsyncpa [#allocation5], 1 }

</bundles_post_ra>
